<compile_context>
chip_gen: v7x
topology: tpu7x:2x2x1
jax: 0.10.0
libtpu: 0.0.40
codegen_flags: <defaults>
</compile_context>

<pallas_src>
import functools

import jax
import jax.numpy as jnp
from jax.experimental import pallas as pl
from jax.experimental.pallas import tpu as pltpu


def _round_up(n, m):
    return (n + m - 1) // m * m


def ctx_gating_kernel(x_ref, w_ref, b_ref, o_ref, acc_ref, *, tn, tk):
    # x_ref:   (tm, dim_p) bf16 -- full feature rows, resident across j and k
    # w_ref:   (tk, tn)    bf16 -- weight block, (in, out) layout
    # b_ref:   (1, tn)     f32  -- bias stripe
    # o_ref:   (tm, tn)         -- output block (same block across k)
    # acc_ref: (tm, tn)    f32  -- VMEM accumulator scratch
    j = pl.program_id(1)
    k = pl.program_id(2)

    @pl.when(k == 0)
    def _init():
        acc_ref[...] = jnp.zeros_like(acc_ref)

    # Contraction chunk of the resident x block (128-aligned dynamic slice).
    x_chunk = x_ref[:, pl.ds(pl.multiple_of(k * tk, 128), tk)]
    acc_ref[...] += jnp.dot(x_chunk, w_ref[...],
                            preferred_element_type=jnp.float32)

    @pl.when(k == pl.num_programs(2) - 1)
    def _epilogue():
        z = acc_ref[...] + b_ref[...]                          # f32
        # sigmoid via EUP exp + approximate reciprocal (VPU slot stays free).
        gate = pl.reciprocal(1.0 + jnp.exp(-z), approx=True)
        xg = x_ref[:, pl.ds(pl.multiple_of(j * tn, 128), tn)]  # gating stripe
        o_ref[...] = (gate * xg.astype(jnp.float32)).astype(o_ref.dtype)


def context_gating(x, weight, bias, *, tm=None, tn=512):
    """y = sigmoid(x @ weight.T + bias) * x.

    x: (..., dim); weight: (dim, dim) in PyTorch (out, in) layout; bias: (dim,).
    Matmul/gating inputs are bf16 with f32 accumulation (intentional precision
    trade vs. the pure-f32 reference).
    """
    orig_shape = x.shape
    dim = orig_shape[-1]
    assert weight.shape == (dim, dim) and bias.shape == (dim,)
    x2d = x.reshape(-1, dim)
    M = x2d.shape[0]
    out_dtype = x.dtype
    out_itemsize = jnp.dtype(out_dtype).itemsize

    # ---- generation-aware budgets -------------------------------------------
    try:
        vmem_cap = int(pltpu.get_tpu_info().vmem_capacity_bytes)
    except Exception:
        vmem_cap = 64 << 20            # conservative (v7x-sized)
    vmem_budget = max(vmem_cap - (8 << 20), 16 << 20)

    # Lane-dense output stripe (multiple of 128); pad dim up to a multiple of it.
    tn = _round_up(max(128, min(tn, _round_up(dim, 128))), 128)
    dim_p = _round_up(dim, tn)

    # Row tile toward the weight-stream balance point, clamped for small M.
    if tm is None:
        tm = 512 if vmem_cap >= (96 << 20) else 384   # v5e/v6e vs. v7x
    tm = max(8, min(_round_up(tm, 8), _round_up(M, 8)))

    def working_set(tm_, tk_):
        return (2 * tm_ * dim_p * 2          # bf16 x row block (double-buffered)
                + 2 * tk_ * tn * 2           # bf16 weight block
                + 2 * tm_ * tn * out_itemsize  # output block
                + tm_ * tn * 4               # f32 accumulator scratch
                + 2 * tn * 4)                # bias stripe

    # Shrink tm (multiples of 8) if even a minimal K tile cannot fit.
    min_tk = min(dim_p, 512)
    while tm > 8 and working_set(tm, min_tk) > vmem_budget:
        tm = max(8, (tm // 2) // 8 * 8)
    m_p = _round_up(M, tm)

    # Largest K tile (multiple of 128 dividing dim_p) that fits the budget.
    units = dim_p // 128
    tk = 128
    for d in range(units, 0, -1):
        if units % d == 0 and working_set(tm, d * 128) <= vmem_budget:
            tk = d * 128
            break
    nk = dim_p // tk

    # ---- one-time operand prep ----------------------------------------------
    x_bf16 = x2d.astype(jnp.bfloat16)
    if m_p != M or dim_p != dim:
        x_bf16 = jnp.pad(x_bf16, ((0, m_p - M), (0, dim_p - dim)))

    w_t = weight.T.astype(jnp.bfloat16)          # (in, out) layout, bf16
    b_f32 = bias.astype(jnp.float32)
    if dim_p != dim:
        w_t = jnp.pad(w_t, ((0, dim_p - dim), (0, dim_p - dim)))
        b_f32 = jnp.pad(b_f32, (0, dim_p - dim))
    b2d = b_f32.reshape(1, dim_p)

    grid = (m_p // tm, dim_p // tn, nk)
    vmem_limit = int(min(working_set(tm, tk) + (16 << 20), vmem_cap - (8 << 20)))

    kernel = functools.partial(ctx_gating_kernel, tn=tn, tk=tk)

    out_p = pl.pallas_call(
        kernel,
        out_shape=jax.ShapeDtypeStruct((m_p, dim_p), out_dtype),
        grid_spec=pltpu.PrefetchScalarGridSpec(
            num_scalar_prefetch=0,
            grid=grid,
            in_specs=[
                pl.BlockSpec((tm, dim_p), lambda i, j, k: (i, 0)),  # x rows, resident
                pl.BlockSpec((tk, tn), lambda i, j, k: (k, j)),     # W^T block
                pl.BlockSpec((1, tn), lambda i, j, k: (0, j)),      # bias stripe
            ],
            out_specs=pl.BlockSpec((tm, tn), lambda i, j, k: (i, j)),
            scratch_shapes=[pltpu.VMEM((tm, tn), jnp.float32)],
        ),
        compiler_params=pltpu.CompilerParams(
            dimension_semantics=("parallel", "parallel", "arbitrary"),
            vmem_limit_bytes=vmem_limit,
        ),
    )(x_bf16, w_t, b2d)

    out = out_p[:M, :dim]
    return out.reshape(orig_shape)


def context_gating_ref(x, weight, bias):
    gated = jax.nn.sigmoid(x @ weight.T + bias)
    return gated * x


if __name__ == "__main__":
    batch, dim = 2, 32

    key = jax.random.PRNGKey(0)
    kx, kw, kb = jax.random.split(key, 3)

    x = jax.random.normal(kx, (batch, dim), dtype=jnp.float32)

    # Deterministic init mirroring the PyTorch module:
    #   weight: xavier_normal_ -> std = sqrt(2 / (fan_in + fan_out)) = sqrt(1/dim)
    #   bias:   nn.Linear default uniform(-1/sqrt(fan_in), 1/sqrt(fan_in))
    w_std = (2.0 / (dim + dim)) ** 0.5
    weight = w_std * jax.random.normal(kw, (dim, dim), dtype=jnp.float32)  # (out, in)
    b_bound = 1.0 / (dim ** 0.5)
    bias = jax.random.uniform(kb, (dim,), dtype=jnp.float32,
                              minval=-b_bound, maxval=b_bound)

    out = context_gating(x, weight, bias)
    out = jax.block_until_ready(out)

    ref = context_gating_ref(x, weight, bias)
    assert out.shape == ref.shape and out.dtype == ref.dtype
    # bf16 matmul + gating inputs -> loosened tolerance vs the f32 reference.
    assert jnp.allclose(out, ref, atol=2e-2, rtol=2e-2), "mismatch vs reference"

    print("KERNEL_OK")
</pallas_src>

<mosaic_0001>
module attributes {stable_mosaic.version = 11 : i64} {
  func.func @ctx_gating_kernel(%arg0: i32, %arg1: i32, %arg2: i32, %arg3: memref<8x128xbf16, #tpu.memory_space<vmem>>, %arg4: memref<128x128xbf16, #tpu.memory_space<vmem>>, %arg5: memref<1x128xf32, #tpu.memory_space<vmem>>, %arg6: memref<8x128xf32, #tpu.memory_space<vmem>>, %arg7: memref<8x128xf32, #tpu.memory_space<vmem>>) attributes {dimension_semantics = [#tpu.dimension_semantics<parallel>, #tpu.dimension_semantics<parallel>, #tpu.dimension_semantics<arbitrary>], iteration_bounds = array<i64: 1, 1, 1>, scalar_prefetch = 0 : i64, scratch_operands = 1 : i64, tpu.core_type = #tpu.core_type<tc>, window_params = [{transform_indices = @transform_0, window_bounds = array<i64: 8, 128>}, {transform_indices = @transform_1, window_bounds = array<i64: 128, 128>}, {transform_indices = @transform_2, window_bounds = array<i64: 1, 128>}, {transform_indices = @transform_3, window_bounds = array<i64: 8, 128>}]} {
    %c0_i32 = arith.constant 0 : i32
    %0 = arith.cmpi eq, %arg2, %c0_i32 : i32
    %1 = arith.extui %0 : i1 to i32
    %c0_i32_0 = arith.constant 0 : i32
    %2 = arith.cmpi ne, %1, %c0_i32_0 : i32
    scf.if %2 {
      %cst_9 = arith.constant 0.000000e+00 : f32
      %15 = vector.broadcast %cst_9 : f32 to vector<8x128xf32>
      %c0_10 = arith.constant 0 : index
      %c0_11 = arith.constant 0 : index
      %16 = vector.load %arg7[%c0_10, %c0_11] : memref<8x128xf32, #tpu.memory_space<vmem>>, vector<8x128xf32>
      tpu.vector_store %arg7[%c0_10, %c0_11], %15 {strides = array<i32>} : memref<8x128xf32, #tpu.memory_space<vmem>>, vector<8x128xf32>,
    } else {
    }
    %c128_i32 = arith.constant 128 : i32
    %3 = arith.muli %arg2, %c128_i32 : i32
    %4 = tpu.assume_multiple %3, 128 : i32
    %c0 = arith.constant 0 : index
    %5 = arith.index_cast %4 : i32 to index
    %6 = vector.load %arg3[%c0, %5] : memref<8x128xbf16, #tpu.memory_space<vmem>>, vector<8x128xbf16>
    %c0_1 = arith.constant 0 : index
    %c0_2 = arith.constant 0 : index
    %7 = vector.load %arg7[%c0_1, %c0_2] : memref<8x128xf32, #tpu.memory_space<vmem>>, vector<8x128xf32>
    %c0_3 = arith.constant 0 : index
    %c0_4 = arith.constant 0 : index
    %8 = vector.load %arg4[%c0_3, %c0_4] : memref<128x128xbf16, #tpu.memory_space<vmem>>, vector<128x128xbf16>
    %cst = arith.constant dense<0.000000e+00> : vector<8x128xf32>
    %9 = tpu.matmul %6, %8, %cst {dimension_numbers = #tpu.dot_dimension_numbers<[1], [0], [0], [1], [0, 0, 1, 1], [], []>} : vector<8x128xbf16>, vector<128x128xbf16>, vector<8x128xf32> -> vector<8x128xf32>
    %10 = arith.addf %7, %9 : vector<8x128xf32>
    %c0_5 = arith.constant 0 : index
    %c0_6 = arith.constant 0 : index
    %11 = vector.load %arg7[%c0_5, %c0_6] : memref<8x128xf32, #tpu.memory_space<vmem>>, vector<8x128xf32>
    tpu.vector_store %arg7[%c0_5, %c0_6], %10 {strides = array<i32>} : memref<8x128xf32, #tpu.memory_space<vmem>>, vector<8x128xf32>,
    %c0_i32_7 = arith.constant 0 : i32
    %12 = arith.cmpi eq, %arg2, %c0_i32_7 : i32
    %13 = arith.extui %12 : i1 to i32
    %c0_i32_8 = arith.constant 0 : i32
    %14 = arith.cmpi ne, %13, %c0_i32_8 : i32
    scf.if %14 {
      %c0_9 = arith.constant 0 : index
      %c0_10 = arith.constant 0 : index
      %15 = vector.load %arg7[%c0_9, %c0_10] : memref<8x128xf32, #tpu.memory_space<vmem>>, vector<8x128xf32>
      %c0_11 = arith.constant 0 : index
      %c0_12 = arith.constant 0 : index
      %16 = vector.load %arg5[%c0_11, %c0_12] : memref<1x128xf32, #tpu.memory_space<vmem>>, vector<1x128xf32>
      %17 = vector.broadcast %16 : vector<1x128xf32> to vector<8x128xf32>
      %18 = arith.addf %15, %17 : vector<8x128xf32>
      %cst_13 = arith.constant 0.000000e+00 : f32
      %19 = vector.broadcast %cst_13 : f32 to vector<8x128xf32>
      %20 = arith.subf %19, %18 : vector<8x128xf32>
      %21 = math.exp %20 : vector<8x128xf32>
      %cst_14 = arith.constant 1.000000e+00 : f32
      %22 = vector.broadcast %cst_14 : f32 to vector<8x128xf32>
      %23 = arith.addf %22, %21 : vector<8x128xf32>
      %24 = tpu.reciprocal %23 {approx = true} : vector<8x128xf32> -> vector<8x128xf32>
      %c128_i32_15 = arith.constant 128 : i32
      %25 = arith.muli %arg1, %c128_i32_15 : i32
      %26 = tpu.assume_multiple %25, 128 : i32
      %c0_16 = arith.constant 0 : index
      %27 = arith.index_cast %26 : i32 to index
      %28 = vector.load %arg3[%c0_16, %27] : memref<8x128xbf16, #tpu.memory_space<vmem>>, vector<8x128xbf16>
      %29 = arith.extf %28 : vector<8x128xbf16> to vector<8x128xf32>
      %30 = arith.mulf %24, %29 : vector<8x128xf32>
      %c0_17 = arith.constant 0 : index
      %c0_18 = arith.constant 0 : index
      %31 = vector.load %arg6[%c0_17, %c0_18] : memref<8x128xf32, #tpu.memory_space<vmem>>, vector<8x128xf32>
      tpu.vector_store %arg6[%c0_17, %c0_18], %30 {strides = array<i32>} : memref<8x128xf32, #tpu.memory_space<vmem>>, vector<8x128xf32>,
    } else {
    }
    return
  }
  func.func @transform_0(%arg0: i32, %arg1: i32, %arg2: i32) -> (i32, i32) {
    %c0_i32 = arith.constant 0 : i32
    %c0_i32_0 = arith.constant 0 : i32
    return %arg0, %c0_i32 : i32, i32
  }
  func.func @transform_1(%arg0: i32, %arg1: i32, %arg2: i32) -> (i32, i32) {
    %c0_i32 = arith.constant 0 : i32
    return %arg2, %arg1 : i32, i32
  }
  func.func @transform_2(%arg0: i32, %arg1: i32, %arg2: i32) -> (i32, i32) {
    %c0_i32 = arith.constant 0 : i32
    %c0_i32_0 = arith.constant 0 : i32
    return %c0_i32, %arg1 : i32, i32
  }
  func.func @transform_3(%arg0: i32, %arg1: i32, %arg2: i32) -> (i32, i32) {
    %c0_i32 = arith.constant 0 : i32
    return %arg0, %arg1 : i32, i32
  }
}

</mosaic_0001>

<bundles_post_ra>
// kernel: tpu_custom_call.1
= control target key start
LH: loop header
LB: loop body
LE: loop exit
PB: predicated region body
PF: predicated region fallthrough
CT: control target
= control target key end

     0   :  { %8 = vsyncpa [#allocation4], 0  ;;  %s408_s0 = inlined_call_operand.hbm [shape: bf16[8,128], index: 0, kind: input, shape index: {}]   ;;  %s409_s1 = inlined_call_operand.hbm [shape: bf16[128,128], index: 1, kind: input, shape index: {}]   ;;  %s410_s2 = inlined_call_operand.vmem [shape: f32[1,128], index: 2, kind: input, shape index: {}]   ;;  %s411_s3 = inlined_call_operand.hbm [shape: f32[8,128], index: 3, kind: output, shape index: {}]  }
   0x1   :  { %9 = vsyncpa [#allocation7], 0 }
   0x2   :  { %10 = vsyncpa [#allocation5], 0  ;;  %s335_s12 = smov [#allocation3]   ;;  %s336_s14 = smov [#allocation6]  }
   0x3   :  { %s17_s13 = sshll.u32 %s335_s12, 4  ;;  %s26_s15 = sshll.u32 %s336_s14, 4  ;;  %s18_s13 = int_to_ptr.vmem [resolvable:$true] %s17_s13  ;;  %s362_s15 = int_to_ptr.vmem [resolvable:$true] %s26_s15 }
   0x4   :  { %s263_s18 = scalar_lea.hbm %s408_s0, 64 }
   0x5   :  { %p264_p0 = scmp.ne.s32.totalorder %s408_s0, %s263_s18  ;;  %p267_p1 = scmp.lt.u32.totalorder %s263_s18, %s408_s0 }
   0x7   :  { %p269_p2 = pnand %p267_p1, %p264_p0 }
   0x9   :  { %272 = shalt.err (!%p269_p2)
}
   0xa   :  { %s273_s23 = scalar_lea.vmem %s18_s13, 64  ;;  %p278_p4 = scmp.lt.s32.totalorder %s18_s13, %s18_s13 }
   0xb   :  { %p274_p3 = scmp.ne.s32.totalorder %s18_s13, %s273_s23  ;;  %p279_p5 = scmp.lt.s32.totalorder %s273_s23, %s273_s23 }
   0xd   :  { %p280_p6 = por %p279_p5, %p278_p4 }
   0xf   :  { %p281_p7 = pnand %p280_p6, %p274_p3 }
  0x11   :  { %284 = shalt.err (!%p281_p7)
}
  0x12   :  { %20 = dma.hbm_to_vmem [thread:$0]  %s408_s0, 64, %s18_s13, [#allocation4]  }
  0x13   :  { %s285_s28 = scalar_lea.hbm %s409_s1, 1024 }
  0x14   :  { %p286_p8 = scmp.ne.s32.totalorder %s409_s1, %s285_s28  ;;  %p289_p9 = scmp.lt.u32.totalorder %s285_s28, %s409_s1 }
  0x16   :  { %p291_p10 = pnand %p289_p9, %p286_p8 }
  0x18   :  { %294 = shalt.err (!%p291_p10)
}
  0x19   :  { %s295_s6 = scalar_lea.vmem %s362_s15, 1024  ;;  %p300_p12 = scmp.lt.s32.totalorder %s362_s15, %s362_s15 }
  0x1a   :  { %p296_p11 = scmp.ne.s32.totalorder %s362_s15, %s295_s6  ;;  %p301_p13 = scmp.lt.s32.totalorder %s295_s6, %s295_s6 }
  0x1c   :  { %p302_p0 = por %p301_p13, %p300_p12 }
  0x1e   :  { %p303_p1 = pnand %p302_p0, %p296_p11 }
  0x20   :  { %306 = shalt.err (!%p303_p1)
}
  0x21   :  { %s337_s0 = smov 64   ;;  %s338_s7 = smov 4  }
  0x22   :  { %32 = dma.hbm_to_vmem [thread:$0]  %s409_s1, 1024, %s362_s15, [#allocation7], %s337_s0, %s337_s0, %s338_s7  }
  0x23   :  { %329 = dma.done.wait [#allocation4], 64  }
  0x24   :  { %330 = vsyncadd [#allocation4], 4294967232 }
  0x25   :  { %331 = dma.done.wait [#allocation7], 1024  }
  0x26   :  { %332 = vsyncadd [#allocation7], 4294966272  ;;  %v339_v0 = vmov 0.0   ;;  %vm340_vm0 = vmmov 0   ;;  %v251_v1 = vld [vmem:[#allocation6] sm:$0xff]   ;;  %v252_v2 = vld [vmem:[#allocation6 + $0x8] sm:$0xff]  }
  0x27   :  { %224 = vmatprep.subr.bf16.mxu0 %v339_v0  ;;  %240 = vmatprep.mubr.msk.bf16.mxu0 %vm340_vm0, %v339_v0  ;;  %v253_v3 = vld [vmem:[#allocation6 + $0x10] sm:$0xff]   ;;  %v254_v4 = vld [vmem:[#allocation6 + $0x18] sm:$0xff]   ;;  %v255_v5 = vld [vmem:[#allocation6 + $0x20] sm:$0xff]   ;;  %s341_s11 = smov [#allocation8]  }
  0x28   :  { %225 = vmatpush3.bf16.msra.mxu0 %v251_v1  ;;  %v256_v6 = vld [vmem:[#allocation6 + $0x28] sm:$0xff]   ;;  %v257_v7 = vld [vmem:[#allocation6 + $0x30] sm:$0xff]   ;;  %v258_v8 = vld [vmem:[#allocation6 + $0x38] sm:$0xff]   ;;  %s192_s12 = sshll.u32 %s341_s11, 4  ;;  %s193_s12 = int_to_ptr.vmem [resolvable:$true] %s192_s12 }
  0x29   :  { %226 = vmatprep.subr.bf16.mxu0 %v339_v0  ;;  %v52_v9 = vld [vmem:[#allocation3] sm:$0xf]  ;;  %p312_p3 = scmp.lt.s32.totalorder %s193_s12, %s193_s12 }
  0x2a   :  { %v214_v10 = vld [vmem:[%s410_s2] ss:$0 sm:$0xff]  ;;  %s307_s2 = scalar_lea.vmem %s193_s12, 128 }
  0x2b   :  { %v182_v20 = vld [vmem:[#allocation3] sm:$0xf]  ;;  %p308_p2 = scmp.ne.s32.totalorder %s193_s12, %s307_s2  ;;  %p313_p4 = scmp.lt.s32.totalorder %s307_s2, %s307_s2 }
  0x2c   :  { %227 = vmatpush3.bf16.msra.mxu0 %v252_v2  ;;  %v183_v21 = vunpack.c.l.bf16 %v182_v20 }
  0x2d   :  { %228 = vmatprep.subr.bf16.mxu0 %v339_v0  ;;  %p314_p5 = por %p313_p4, %p312_p3 }
  0x2f   :  { %p315_p6 = pnand %p314_p5, %p308_p2 }
  0x30   :  { %229 = vmatpush3.bf16.msra.mxu0 %v253_v3 }
  0x31   :  { %230 = vmatprep.subr.bf16.mxu0 %v339_v0 }
  0x34   :  { %231 = vmatpush3.bf16.msra.mxu0 %v254_v4 }
  0x35   :  { %232 = vmatprep.subr.bf16.mxu0 %v339_v0 }
  0x38   :  { %233 = vmatpush3.bf16.msra.mxu0 %v255_v5 }
  0x39   :  { %234 = vmatprep.subr.bf16.mxu0 %v339_v0 }
  0x3c   :  { %235 = vmatpush3.bf16.msra.mxu0 %v256_v6 }
  0x3d   :  { %236 = vmatprep.subr.bf16.mxu0 %v339_v0 }
  0x40   :  { %237 = vmatpush3.bf16.msra.mxu0 %v257_v7 }
  0x41   :  { %238 = vmatprep.subr.bf16.mxu0 %v339_v0 }
  0x44   :  { %239 = vmatpush3.bf16.msra.mxu0 %v258_v8 }
  0x47   :  { %241 = vmatmul.mubr.bf16.vlgmr.msra.gmra.mrb[0].mxu0 %v52_v9 }
 0x11a   :  { %v152_v11 = vpop.f32.mrb[0].mxu0 }
 0x11b   :  { %v171_v12 = vadd.f32 %v214_v10, %v152_v11  ;;  %v242_v13 = vpop.f32.mrb[1].mxu0 }
 0x11c   :  { %v155_v14 = vpop.f32.mrb[2].mxu0 }
 0x11d   :  { %v172_v15 = vsub.f32 0.0, %v171_v12  ;;  %v243_v16 = vpop.f32.mrb[3].mxu0 }
 0x11f   :  { %v173_v17 = vmul.f32 1.442695, %v172_v15 }
 0x121   :  { %259 = vpow2.f32 %v173_v17 }
 0x12b   :  { %v260_v18 = vpop.eup %259 }
 0x12c   :  { %v175_v19 = vadd.f32 1.0, %v260_v18 }
 0x12e   :  { %261 = vrcp.f32 %v175_v19 }
 0x138   :  { %v262_v22 = vpop.eup %261 }
 0x139   :  { %v184_v23 = vmul.f32 %v262_v22, %v183_v21 }
 0x13b   :  { %185 = vst [vmem:[#allocation8] sm:$0xff] %v184_v23 }
 0x13c   :  { %318 = shalt.err (!%p315_p6)
}
 0x13d   :  { %s319_s15 = scalar_lea.hbm %s411_s3, 128 }
 0x13e   :  { %p320_p7 = scmp.ne.s32.totalorder %s411_s3, %s319_s15  ;;  %p323_p8 = scmp.lt.u32.totalorder %s319_s15, %s411_s3 }
 0x140   :  { %p325_p9 = pnand %p323_p8, %p320_p7 }
 0x142   :  { %328 = shalt.err (!%p325_p9)
}
 0x143   :  { %195 = dma.vmem_to_hbm [thread:$0]  %s193_s12, 128, %s411_s3, [#allocation5]  }
 0x144   :  { %333 = dma.done.wait [#allocation5], 128  }
 0x145   :  { %334 = vsyncadd [#allocation5], 4294967168 }
 0x146   :  { %199 = vsyncpa [#allocation4], 1 }
 0x147   :  { %200 = vsyncpa [#allocation7], 1 }
 0x148   :  { %201 = vsyncpa [#allocation5], 1 }

</bundles_post_ra>
